<compile_context>
chip_gen: v5e
topology: v5e:2x2
jax: 0.10.0
libtpu: 0.0.40
codegen_flags: <defaults>
</compile_context>

<pallas_src>
import functools

import jax
import jax.numpy as jnp
import numpy as np
from jax.experimental import pallas as pl
from jax.experimental.pallas import tpu as pltpu


def _band_kernel(meta_ref, x_ref, o_ref, *, axis, block_len):
    """Zero up to two [start, end) bands along `axis` of the current block.

    meta_ref: SMEM int32[4 + n_jobs] =
        [b0_start, b0_end, b1_start, b1_end, job_block_idx_0, ...]
    x_ref / o_ref: VMEM block (b_blk, C, f_dim, t_dim); o aliases x in HBM.
    """
    j = pl.program_id(1)
    # Absolute element offset of this block along the masked axis.
    start = meta_ref[4 + j] * block_len

    shape = [1, 1, 1, 1]
    shape[axis] = x_ref.shape[axis]
    if axis != 3:
        shape[3] = x_ref.shape[3]  # keep lanes dense -> no bool lane-broadcast
    idx = start + jax.lax.broadcasted_iota(jnp.int32, tuple(shape), axis)

    masked = (
        ((idx >= meta_ref[0]) & (idx < meta_ref[1]))
        | ((idx >= meta_ref[2]) & (idx < meta_ref[3]))
    )
    # Select, not multiply: matches masked_fill for NaN/Inf and avoids -0.0.
    o_ref[...] = jnp.where(masked, jnp.zeros((), x_ref.dtype), x_ref[...])


def _leading_block(b, inner_bytes, target_bytes=8 << 20, min_steps=4):
    """Leading-axis block: <= ~target_bytes per VMEM buffer and >= min_steps
    grid steps along the 'parallel' axis (pipeline overlap + v7x 2-TC split)."""
    by_vmem = max(1, target_bytes // max(1, inner_bytes))
    by_steps = max(1, -(-b // min_steps))            # cdiv(b, min_steps)
    return max(1, min(b, by_vmem, by_steps))


def _apply_band_pass(x, bands, axis):
    """Zero-fill `bands` along `axis` (2=freq, 3=time) of x, touching only the
    blocks that intersect a band; all other data stays in place via aliasing."""
    B, C, F, T = x.shape
    L = x.shape[axis]
    bands = [(max(0, int(s)), min(L, int(e))) for s, e in bands]
    bands = [(s, e) for s, e in bands if e > s]
    if not bands:
        return x                    # early-out: no pallas_call, no HBM traffic

    itemsize = x.dtype.itemsize
    if axis == 2:                   # frequency stripes: sublane-tile rows
        sublane = max(8, 32 // itemsize)       # 8 f32 / 16 bf16 / 32 int8
        blk_len = F if F <= sublane else sublane
        tail = (blk_len, T)
    else:                           # time stripes: lane-tile columns
        blk_len = T if T <= 128 else 128
        tail = (F, blk_len)

    # Distinct block indices covering every band (Python ints; band positions
    # themselves go to the device as runtime scalars -> no recompiles).
    jobs = []
    for s, e in bands:
        for bidx in range(s // blk_len, (e - 1) // blk_len + 1):
            if bidx not in jobs:
                jobs.append(bidx)
    jobs.sort()
    n_jobs = len(jobs)

    inner_bytes = C * tail[0] * tail[1] * itemsize
    b_blk = _leading_block(B, inner_bytes)
    block_bytes = b_blk * inner_bytes

    if axis == 2:
        block_shape = (b_blk, C, blk_len, T)
        index_map = lambda b, j, meta: (b, 0, meta[4 + j], 0)
    else:
        block_shape = (b_blk, C, F, blk_len)
        index_map = lambda b, j, meta: (b, 0, 0, meta[4 + j])
    spec = pl.BlockSpec(block_shape, index_map)

    b0 = bands[0]
    b1 = bands[1] if len(bands) > 1 else (0, 0)
    meta = jnp.asarray([b0[0], b0[1], b1[0], b1[1]] + jobs, dtype=jnp.int32)

    # 4 double-buffers x <= 8 MiB + headroom; under v7x's 64 MiB physical VMEM
    # and a safe raise over the v5e 16 MiB scoped default.
    vmem_limit = int(min(60 << 20, max(48 << 20, 5 * block_bytes)))

    grid = (pl.cdiv(B, b_blk), n_jobs)

    return pl.pallas_call(
        functools.partial(_band_kernel, axis=axis, block_len=blk_len),
        out_shape=jax.ShapeDtypeStruct(x.shape, x.dtype),
        grid_spec=pltpu.PrefetchScalarGridSpec(
            num_scalar_prefetch=1,
            grid=grid,
            in_specs=[spec],
            out_specs=spec,
        ),
        # Operand 0 is the prefetched meta vector; operand 1 (x) aliases
        # output 0, so blocks the grid never visits keep their input values.
        input_output_aliases={1: 0},
        compiler_params=pltpu.CompilerParams(
            # TODO(synk): on v7x verify the leading 'parallel' axis shards
            # across both TensorCores; switch to CORE_PARALLEL if it does not.
            dimension_semantics=("parallel", "arbitrary"),
            vmem_limit_bytes=vmem_limit,
        ),
    )(meta, x)


def specaugment_pallas(x, mask_params):
    """x: (B, C, F, T); mask_params: 8 host ints
    [f0s, f0e, f1s, f1e, t0s, t0e, t1s, t1e]. Returns the masked tensor."""
    p = [int(v) for v in mask_params]
    out = _apply_band_pass(x, [(p[0], p[1]), (p[2], p[3])], axis=2)   # freq
    out = _apply_band_pass(out, [(p[4], p[5]), (p[6], p[7])], axis=3)  # time
    return out


def make_specaugment_params(key, rate, freq_mask_param, time_mask_param, F, T):
    """Host-side glue reproducing SpecAugment.policy3's random decisions.

    Emits 8 Python ints [f0s, f0e, f1s, f1e, t0s, t0e, t1s, t1e]; inactive
    masks get start == end == 0.
    """
    # One vectorized draw + one device->host sync.
    # TODO(synk): torch's RNG stream cannot be reproduced bit-exactly in JAX;
    # draws reproduce the distribution/semantics, not identical values.
    u = np.asarray(jax.random.uniform(key, (10,), dtype=jnp.float32))

    p_policy = float(u[0])          # torch.rand(1,1).item() in policy3
    p_apply = float(u[1])           # torch.rand(1,1).item() in policy1/2
    use_policy1 = p_policy > 0.5
    apply = rate > p_apply
    n_masks = 0 if not apply else (1 if use_policy1 else 2)

    draws = iter(u[2:])
    params = []
    for axis_len, mask_param in ((F, freq_mask_param), (T, time_mask_param)):
        for i in range(2):
            if i < n_masks:
                value = float(next(draws)) * mask_param
                min_value = float(next(draws)) * (axis_len - value)
                start = int(min_value)
                end = int(min_value) + int(value)   # torchaudio: int(min)+int(value)
                params += [start, end]
            else:
                params += [0, 0]
    return params


def specaugment_ref(x, p):
    """Pure-JAX reference for correctness check."""
    F, T = x.shape[2], x.shape[3]
    f_idx = jnp.arange(F)[:, None]
    t_idx = jnp.arange(T)[None, :]
    mask = (
        ((f_idx >= p[0]) & (f_idx < p[1]))
        | ((f_idx >= p[2]) & (f_idx < p[3]))
        | ((t_idx >= p[4]) & (t_idx < p[5]))
        | ((t_idx >= p[6]) & (t_idx < p[7]))
    )
    return jnp.where(mask[None, None], jnp.zeros((), x.dtype), x)


if __name__ == "__main__":
    B, C, F, T = 2, 4, 16, 16
    key = jax.random.PRNGKey(0)
    k1, k2, k3 = jax.random.split(key, 3)

    # Case 1: fixed band parameters exercising both passes (2 freq stripes in
    # different sublane tiles + 2 time bands inside one lane tile).
    x1 = jax.random.normal(k1, (B, C, F, T), dtype=jnp.float32)
    params1 = [3, 5, 9, 10, 2, 6, 12, 14]
    ref1 = specaugment_ref(x1, params1)
    out1 = jax.block_until_ready(specaugment_pallas(x1, params1))
    assert out1.shape == x1.shape and out1.dtype == x1.dtype
    assert jnp.allclose(out1, ref1), "Pallas output mismatch (fixed params)"

    # Case 2: parameters drawn exactly as SpecAugment.policy3 would
    # (rate=1.0 so the augmentation branch is always taken).
    x2 = jax.random.normal(k2, (B, C, F, T), dtype=jnp.float32)
    params2 = make_specaugment_params(
        k3, rate=1.0, freq_mask_param=2, time_mask_param=4, F=F, T=T)
    ref2 = specaugment_ref(x2, params2)
    out2 = jax.block_until_ready(specaugment_pallas(x2, params2))
    assert jnp.allclose(out2, ref2), "Pallas output mismatch (policy3 params)"

    print("KERNEL_OK")
</pallas_src>

<mosaic_0001>
module attributes {stable_mosaic.version = 11 : i64} {
  func.func @_band_kernel(%arg0: i32, %arg1: i32, %arg2: memref<6xi32, #tpu.memory_space<smem>>, %arg3: memref<1x4x8x16xf32, #tpu.memory_space<vmem>>, %arg4: memref<1x4x8x16xf32, #tpu.memory_space<vmem>>) attributes {dimension_semantics = [#tpu.dimension_semantics<parallel>, #tpu.dimension_semantics<arbitrary>], iteration_bounds = array<i64: 2, 2>, scalar_prefetch = 1 : i64, scratch_operands = 0 : i64, tpu.core_type = #tpu.core_type<tc>, window_params = [{transform_indices = @transform_0, window_bounds = array<i64: 1, 4, 8, 16>}, {transform_indices = @transform_1, window_bounds = array<i64: 1, 4, 8, 16>}]} {
    %c4_i32 = arith.constant 4 : i32
    %0 = arith.addi %c4_i32, %arg1 : i32
    %1 = arith.index_cast %0 : i32 to index
    %2 = memref.load %arg2[%1] : memref<6xi32, #tpu.memory_space<smem>>
    %c8_i32 = arith.constant 8 : i32
    %3 = arith.muli %2, %c8_i32 : i32
    %4 = tpu.iota {dimensions = array<i32: 2>} : vector<1x1x8x16xi32>
    %5 = vector.broadcast %3 : i32 to vector<1x1x8x16xi32>
    %6 = arith.addi %5, %4 : vector<1x1x8x16xi32>
    %c0 = arith.constant 0 : index
    %7 = memref.load %arg2[%c0] : memref<6xi32, #tpu.memory_space<smem>>
    %8 = vector.broadcast %7 : i32 to vector<1x1x8x16xi32>
    %9 = arith.cmpi sge, %6, %8 : vector<1x1x8x16xi32>
    %c1 = arith.constant 1 : index
    %10 = memref.load %arg2[%c1] : memref<6xi32, #tpu.memory_space<smem>>
    %11 = vector.broadcast %10 : i32 to vector<1x1x8x16xi32>
    %12 = arith.cmpi slt, %6, %11 : vector<1x1x8x16xi32>
    %13 = arith.andi %9, %12 : vector<1x1x8x16xi1>
    %c2 = arith.constant 2 : index
    %14 = memref.load %arg2[%c2] : memref<6xi32, #tpu.memory_space<smem>>
    %15 = vector.broadcast %14 : i32 to vector<1x1x8x16xi32>
    %16 = arith.cmpi sge, %6, %15 : vector<1x1x8x16xi32>
    %c3 = arith.constant 3 : index
    %17 = memref.load %arg2[%c3] : memref<6xi32, #tpu.memory_space<smem>>
    %18 = vector.broadcast %17 : i32 to vector<1x1x8x16xi32>
    %19 = arith.cmpi slt, %6, %18 : vector<1x1x8x16xi32>
    %20 = arith.andi %16, %19 : vector<1x1x8x16xi1>
    %21 = arith.ori %13, %20 : vector<1x1x8x16xi1>
    %c0_0 = arith.constant 0 : index
    %c0_1 = arith.constant 0 : index
    %c0_2 = arith.constant 0 : index
    %c0_3 = arith.constant 0 : index
    %22 = vector.load %arg3[%c0_0, %c0_1, %c0_2, %c0_3] : memref<1x4x8x16xf32, #tpu.memory_space<vmem>>, vector<1x4x8x16xf32>
    %cst = arith.constant 0.000000e+00 : f32
    %23 = vector.shape_cast %21 : vector<1x1x8x16xi1> to vector<1x1x8x16xi1>
    %24 = vector.broadcast %23 : vector<1x1x8x16xi1> to vector<1x4x8x16xi1>
    %25 = vector.broadcast %cst : f32 to vector<1x4x8x16xf32>
    %26 = arith.select %24, %25, %22 : vector<1x4x8x16xi1>, vector<1x4x8x16xf32>
    %c0_4 = arith.constant 0 : index
    %c0_5 = arith.constant 0 : index
    %c0_6 = arith.constant 0 : index
    %c0_7 = arith.constant 0 : index
    %27 = vector.load %arg4[%c0_4, %c0_5, %c0_6, %c0_7] : memref<1x4x8x16xf32, #tpu.memory_space<vmem>>, vector<1x4x8x16xf32>
    tpu.vector_store %arg4[%c0_4, %c0_5, %c0_6, %c0_7], %26 {strides = array<i32>} : memref<1x4x8x16xf32, #tpu.memory_space<vmem>>, vector<1x4x8x16xf32>,
    return
  }
  func.func @transform_0(%arg0: i32, %arg1: i32, %arg2: memref<6xi32, #tpu.memory_space<smem>>) -> (i32, i32, i32, i32) {
    %c4_i32 = arith.constant 4 : i32
    %0 = arith.addi %c4_i32, %arg1 : i32
    %1 = arith.index_cast %0 : i32 to index
    %2 = memref.load %arg2[%1] : memref<6xi32, #tpu.memory_space<smem>>
    %c0_i32 = arith.constant 0 : i32
    %c0_i32_0 = arith.constant 0 : i32
    %c0_i32_1 = arith.constant 0 : i32
    return %arg0, %c0_i32, %2, %c0_i32_0 : i32, i32, i32, i32
  }
  func.func @transform_1(%arg0: i32, %arg1: i32, %arg2: memref<6xi32, #tpu.memory_space<smem>>) -> (i32, i32, i32, i32) {
    %c4_i32 = arith.constant 4 : i32
    %0 = arith.addi %c4_i32, %arg1 : i32
    %1 = arith.index_cast %0 : i32 to index
    %2 = memref.load %arg2[%1] : memref<6xi32, #tpu.memory_space<smem>>
    %c0_i32 = arith.constant 0 : i32
    %c0_i32_0 = arith.constant 0 : i32
    %c0_i32_1 = arith.constant 0 : i32
    return %arg0, %c0_i32, %2, %c0_i32_0 : i32, i32, i32, i32
  }
}

</mosaic_0001>

<bundles_post_ra>
// kernel: tpu_custom_call.1
= control target key start
LH: loop header
LB: loop body
LE: loop exit
PB: predicated region body
PF: predicated region fallthrough
CT: control target
= control target key end

     0   :  { %s623_s12 = smov [#allocation3]   ;;  %s870_s0 = inlined_call_operand.vmem [shape: s32[6], index: 0, kind: input, shape index: {}]   ;;  %s871_s1 = inlined_call_operand.hbm [shape: f32[2,4,16,16], index: 1, kind: input, shape index: {}, may-alias: {1,2}]   ;;  %s872_s2 = inlined_call_operand.hbm [shape: f32[2,4,16,16], index: 2, kind: output, shape index: {}, may-alias: {1,2}]  }
   0x1   :  { %s8_s11 = sshll.u32 %s870_s0, 4  ;;  %s9_s11 = int_to_ptr.vmem [resolvable:$true] %s8_s11 }
   0x2   :  { %11 = dma.vmem_to_smem %s9_s11, 16, %s623_s12, [#allocation2] }
   0x3   :  { %569 = dma.done.wait [#allocation2], 16 }
   0x4   :  { %570 = vsyncadd [#allocation2], 4294967280 }
   0x5   :  { %14 = sfence }
   0x6   :  { %15 = vsyncpa [#allocation5], 0 }
   0x7   :  { %17 = vsyncpa [#allocation5 + $0x1], 0 }
   0x8   :  { %18 = vsyncpa [#allocation6], 0 }
   0x9   :  { %20 = vsyncpa [#allocation6 + $0x1], 0  ;;  %s648_s13 = smov 0   ;;  %s650_s14 = smov 0  }
   0xa   :  { %s652_s15 = smov 0   ;;  %s654_s16 = smov 0  }
   0xb   :  { %s656_s17 = smov 0   ;;  %s658_s0 = smov 0  }
   0xc   :  { %s660_s18 = smov 0   ;;  %s662_s19 = smov 0  }
   0xd   :  { %s664_s20 = smov 0   ;;  %s666_s21 = smov 0  }
   0xe   :  { %s668_s22 = smov 0  }
   0xf LB: > { %877 = sst [smem:[#allocation14_spill]] %s613_s20  ;;  %s321_s23 = sadd.s32 4294967295, %s621_s22   ;;  %s621_s22 = sphi %s668_s22, %s26_s22   ;;  %s617_s21 = sphi %s666_s21, %s895_s21   ;;  %s613_s20 = sphi %s664_s20, %s902_s20   ;;  %s609_s19 = sphi %s662_s19, %s893_s19   ;;  %s605_s18 = sphi %s660_s18, %s892_s18   ;;  %s601_s0 = sphi %s658_s0, %s901_s0   ;;  %s597_s17 = sphi %s656_s17, %s900_s17   ;;  %s593_s16 = sphi %s654_s16, %s899_s16   ;;  %s589_s15 = sphi %s652_s15, %s898_s15   ;;  %s585_s14 = sphi %s650_s14, %s897_s14   ;;  %s581_s13 = sphi %s648_s13, %s896_s13  }
  0x10   : > { %878 = sst [smem:[#allocation15_spill]] %s617_s21  ;;  %s35_s24 = sadd.s32 1, %s613_s20 }
  0x11   : > { %s38_s25 = sadd.s32 1, %s617_s21  ;;  %p36_p0 = scmp.ge.s32.totalorder %s35_s24, 2 }
  0x12   : > { %s705_s26 = sadd.s32 4, %s613_s20  ;;  %s322_s27 = sadd.s32 4294967294, %s621_s22  }
  0x13   : > { %s43_s28 = sld [smem:[#allocation3 + %s705_s26]]  ;;  %s904_s24 = smov (%p36_p0, %s35_s24), 0 }
  0x14   : > { %879 = sst [smem:[#allocation16_spill]] %s904_s24  ;;  %s906_s25 = smov (!%p36_p0, %s38_s25), %s617_s21 }
  0x15   : > { %s44_s29 = sadd.s32 4, %s904_s24  ;;  %s51_s30 = sadd.s32 1, %s601_s0 }
  0x16   : > { %p40_p1 = scmp.ge.s32.totalorder %s906_s25, 2  ;;  %s45_s3 = sld [smem:[#allocation3 + %s44_s29]] }
  0x17   : > { %p58_p2 = scmp.ne.s32.totalorder %s601_s0, %s597_s17  ;;  %p64_p3 = scmp.ne.s32.totalorder %s597_s17, %s593_s16 }
  0x18   : > { %s908_s25 = smov (%p40_p1, %s906_s25), 0  ;;  %p59_p4 = scmp.eq.s32.totalorder %s621_s22, 0 }
  0x19   : > { %880 = sst [smem:[#allocation17_spill]] %s908_s25  ;;  %p65_p5 = scmp.eq.s32.totalorder %s321_s23, 0 }
  0x1a   : > { %s46_s4 = ssub.s32 %s617_s21, %s908_s25  ;;  %s75_s5 = sld [smem:[#allocation3 + %s705_s26]] }
  0x1b   : > { %p723_p6 = por %p65_p5, %p64_p3  ;;  %s77_s7 = sld [smem:[#allocation3 + %s44_s29]] }
  0x1c   : > { %s47_s8 = ssub.s32 %s43_s28, %s45_s3  ;;  %s83_s9 = sadd.s32 1, %s589_s15 }
  0x1d   : > { %s48_s10 = sor.u32 %s47_s8, %s46_s4  ;;  %p93_p7 = scmp.ne.s32.totalorder %s589_s15, %s585_s14 }
  0x1e   : > { %p49_p8 = scmp.eq.s32.totalorder %s48_s10, 0  ;;  %p94_p9 = scmp.eq.s32.totalorder %s321_s23, 3 }
  0x1f   : > { %p99_p10 = scmp.ne.s32.totalorder %s585_s14, %s581_s13  ;;  %p100_p11 = scmp.eq.s32.totalorder %s322_s27, 3 }
  0x20   : > { %s733_s11 = scalar_select %p49_p8, %s601_s0, %s51_s30  }
  0x21   : > { %s79_s12 = ssub.s32 %s75_s5, %s77_s7  ;;  %p735_p12 = por %p94_p9, %p93_p7 }
  0x22   : > { %882 = sst [smem:[#allocation18_spill]] %s733_s11  ;;  %s80_s29 = sor.u32 %s79_s12, %s46_s4 }
  0x23   : > { %p739_p13 = por %p100_p11, %p99_p10  ;;  %p81_p0 = scmp.eq.s32.totalorder %s80_s29, 0 }
  0x24   : > { %p60_p1 = por %p59_p4, %p58_p2  ;;  %s120_s23 = sand.u32 1, %s601_s0  }
  0x25   : > { %s750_s27 = scalar_select %p81_p0, %s589_s15, %s83_s9  }
  0x26   : > { %p358_p3 = scmp.lt.s32.totalorder %s621_s22, 4  ;;  %s325_s30 = sshll.u32 %s120_s23, 5 }
  0x27   : > { %s340_s3 = scalar_select %p60_p1, [#allocation3], [#allocation8] }
  0x28   : > { %s910_s26 = smov (!%p60_p1, %s705_s26), 0  ;;  %p754_p5 = pnand %p358_p3, %p60_p1 }
  0x29   : > { %s912_s3 = smov (!%p358_p3, %s340_s3), [#allocation10]  ;;  %s914_s26 = smov (!%p358_p3, %s910_s26), 0 }
  0x2a   : > { %s126_s5 = sld [smem:[%s912_s3 + %s914_s26]]  ;;  %s326_s7 = sshll.u32 %s617_s21, 3 }
  0x2b   : > { %s124_s8 = scalar_lea.vmem [#allocation4], %s325_s30  ;;  %p328_p2 = scmp.ge.s32.totalorder %s621_s22, 1 }
  0x2c   : > { %s759_s10 = sshll.u32 %s124_s8, 4  ;;  %p143_p4 = scmp.lt.s32.totalorder %s621_s22, 5  ;;  %s136_s10 = int_to_ptr.vmem [resolvable:$true] %s759_s10 }
  0x2d   : > { %s121_s30 = scalar_lea.sflag [#allocation5], %s120_s23  ;;  %p471_p9 = pneg %p754_p5 }
  0x2e   : > { %p764_p7 = pnand %p328_p2, %p143_p4 }
  0x30   : > { %s130_s12 = sadd.s32 %s326_s7, %s126_s5  ;;  %s474_s5 = scalar_lea.hbm %s871_s1, 128 }
  0x31   : > { %s327_s29 = sshll.u32 %s130_s12, 3 }
  0x32   : > { %s132_s20 = scalar_lea.hbm %s871_s1, %s327_s29 }
  0x33   : > { %s133_s26 = sshll.u32 %s132_s20, 4  ;;  %s134_s26 = int_to_ptr.hbm [resolvable:$true] %s133_s26 }
  0x34   : > { %s467_s3 = sshra.s32 %s134_s26, 4  ;;  %s468_s3 = int_to_ptr.hbm [resolvable:$true] %s467_s3 }
  0x35   : > { %s469_s8 = scalar_lea.hbm %s468_s3, 32  ;;  %p475_p0 = scmp.lt.s32.totalorder %s468_s3, %s871_s1 }
  0x36   : > { %p470_p8 = scmp.ne.s32.totalorder %s468_s3, %s469_s8  ;;  %p476_p1 = scmp.lt.s32.totalorder %s474_s5, %s469_s8 }
  0x38   : > { %p472_p10 = pnand %p471_p9, %p470_p8  ;;  %p477_p3 = por %p476_p1, %p475_p0 }
  0x3a   : > { %p473_p11 = pneg %p472_p10 }
  0x3c   : > { %p478_p2 = pnand %p477_p3, %p473_p11 }
  0x3e   : > { %481 = shalt.err (!%p478_p2)
}
  0x3f   : > { %s624_s20 = smov 256   ;;  %s625_s24 = smov 128  }
  0x40   : > { %s626_s25 = smov 8   ;;  %147 = sbr.rel (%p764_p7) target bundleno = 102 (0x66), region = 24 }
  0x41   : > { %353 = dma.hbm_to_vmem [thread:$0]  (!%p754_p5), %s134_s26, 512, %s136_s10, %s121_s30, %s624_s20, %s625_s24, %s626_s25  }
  0x42   : > { %s149_s21 = sand.u32 (!%p764_p7), 1, %s597_s17  }
  0x43   : > { %s329_s11 = sshll.u32 (!%p764_p7), %s149_s21, 5  ;;  %s150_s23 = scalar_lea.sflag (!%p764_p7), [#allocation5], %s149_s21 }
  0x44   : > { %s784_s29 = scalar_lea.vmem (!%p764_p7), [#allocation4], %s329_s11 }
  0x45   : > { %572 = dma.done.wait (%p723_p6), %s150_s23, 512  }
  0x46   : > { %574 = vsyncadd (%p723_p6), %s150_s23, 4294966784  ;;  %s177_s4 = sadd.s32 4, %s605_s18  ;;  %v180_v0 = vlaneseq  ;;  %s170_s9 = sand.u32 1, %s585_s14   ;;  %v199_v10 = vld [vmem:[%s784_s29] sm:$0xff]  ;;  %v200_v11 = vld [vmem:[%s784_s29 + $0x8] sm:$0xff]  ;;  %vm209_vm6 = vcmask 130048  }
  0x47   : > { %s178_s10 = sld [smem:[#allocation3 + %s177_s4]]  ;;  %s330_s8 = sshll.u32 %s170_s9, 5  ;;  %v201_v12 = vld [vmem:[%s784_s29 + $0x10] sm:$0xff]  ;;  %v202_v13 = vld [vmem:[%s784_s29 + $0x18] sm:$0xff] }
  0x48   : > { %s184_s26 = sld [smem:[#allocation3]]  ;;  %v181_v1 = vshrl.u32 %v180_v0, 7  ;;  %s916_s4 = smov (!%p735_p12, %s177_s4), 0 }
  0x49   : > { %s332_s30 = sld [smem:[#allocation3 + $0x1]]  ;;  %s172_s12 = scalar_lea.vmem [#allocation7], %s330_s8 }
  0x4a   : > { %s333_s3 = sld [smem:[#allocation3 + $0x2]]  ;;  %s230_s20 = sshll.u32 %s172_s12, 4  ;;  %s815_s20 = int_to_ptr.vmem [resolvable:$true] %s230_s20 }
  0x4b   : > { %s334_s5 = sld [smem:[#allocation3 + $0x3]]  ;;  %s336_s24 = sshll.u32 %s609_s19, 3 }
  0x4c   : > { %s344_s6 = scalar_select %p735_p12, [#allocation3], [#allocation9] }
  0x4d   : > { %s331_s7 = sshll.u32 %s178_s10, 3  ;;  %s215_s29 = scalar_lea.sflag [#allocation6], %s170_s9 }
  0x4e   : > { %v182_v2 = vstv %s331_s7  ;;  %v185_v3 = vstv %s184_s26  ;;  %s223_s18 = sld [smem:[%s344_s6 + %s916_s4]]  ;;  %s517_s8 = scalar_lea.hbm %s872_s2, 128 }
  0x4f   : > { %v183_v4 = vadd.s32 %v182_v2, %v181_v1  ;;  %v188_v5 = vstv %s332_s30 }
  0x50   : > { %v192_v6 = vstv %s333_s3 }
  0x51   : > { %vm798_vm0 = vcmp.ge.s32.totalorder %v183_v4, %v185_v3  ;;  %vm802_vm1 = vcmp.lt.s32.totalorder %v183_v4, %v188_v5  ;;  %vm193_vm2 = vcmp.ge.s32.totalorder %v183_v4, %v192_v6  ;;  %v195_v9 = vstv %s334_s5 }
  0x52   : > { %vm190_vm3 = vmand %vm798_vm0, %vm802_vm1  ;;  %vm196_vm4 = vcmp.lt.s32.totalorder %v183_v4, %v195_v9 }
  0x53   : > { %vm197_vm5 = vmand %vm193_vm2, %vm196_vm4 }
  0x54   : > { %vm198_vm7 = vmor %vm190_vm3, %vm197_vm5  ;;  %s227_s25 = sadd.s32 %s336_s24, %s223_s18 }
  0x55   : > { %v205_v14 = vsel %vm198_vm7, 0.0, %v199_v10  ;;  %v206_v15 = vsel %vm198_vm7, 0.0, %v200_v11  ;;  %v207_v16 = vsel %vm198_vm7, 0.0, %v201_v12  ;;  %v208_v17 = vsel %vm198_vm7, 0.0, %v202_v13  ;;  %s337_s21 = sshll.u32 %s227_s25, 3 }
  0x56   : > { %210 = vst.msk [vmem:[%s172_s12] sm:$0xff] %vm209_vm6, %v205_v14  ;;  %s229_s4 = scalar_lea.hbm %s872_s2, %s337_s21 }
  0x57   : > { %211 = vst.msk [vmem:[%s172_s12 + $0x8] sm:$0xff] %vm209_vm6, %v206_v15  ;;  %s232_s19 = sshll.u32 %s229_s4, 4  ;;  %s233_s19 = int_to_ptr.hbm [resolvable:$true] %s232_s19 }
  0x58   : > { %212 = vst.msk [vmem:[%s172_s12 + $0x10] sm:$0xff] %vm209_vm6, %v207_v16  ;;  %s511_s10 = sshra.s32 %s233_s19, 4  ;;  %s512_s10 = int_to_ptr.hbm [resolvable:$true] %s511_s10 }
  0x59   : > { %213 = vst.msk [vmem:[%s172_s12 + $0x18] sm:$0xff] %vm209_vm6, %v208_v17  ;;  %s513_s26 = scalar_lea.hbm %s512_s10, 32  ;;  %p518_p7 = scmp.lt.s32.totalorder %s512_s10, %s872_s2 }
  0x5a   : > { %p514_p6 = scmp.ne.s32.totalorder %s512_s10, %s513_s26  ;;  %p519_p8 = scmp.lt.s32.totalorder %s517_s8, %s513_s26 }
  0x5c   : > { %p515_p5 = pnand %p514_p6, %p735_p12  ;;  %p520_p9 = por %p519_p8, %p518_p7 }
  0x5e   : > { %p516_p4 = pneg %p515_p5 }
  0x60   : > { %p521_p10 = pnand %p520_p9, %p516_p4 }
  0x62   : > { %524 = shalt.err (!%p521_p10)
}
  0x63   : > { %s627_s9 = smov 128   ;;  %s628_s7 = smov 256  }
  0x64   : > { %s629_s18 = smov 8  }
  0x65   : > { %346 = dma.vmem_to_hbm [thread:$0]  (%p735_p12), %s815_s20, 512, %s233_s19, %s215_s29, %s627_s9, %s628_s7, %s629_s18  }
  0x66 PF: > { %p359_p11 = scmp.ge.s32.totalorder %s621_s22, 2  ;;  %s247_s12 = sand.u32 1, %s581_s13  }
  0x67   : > { %s248_s24 = scalar_lea.sflag [#allocation6], %s247_s12 }
  0x68   : > { %p355_p0 = pnand %p359_p11, %p739_p13 }
  0x6a   : > { %p356_p1 = pneg %p355_p0 }
  0x6c   : > { %576 = dma.done.wait (%p356_p1), %s248_s24, 512  }
  0x6d   : > { %578 = vsyncadd (%p356_p1), %s248_s24, 4294966784  ;;  %s26_s22 = sadd.s32 1, %s621_s22   ;;  %s891_s20 = sld [smem:[#allocation18_spill]] }
  0x6e   : > { %p23_p3 = scmp.ge.s32.totalorder %s26_s22, 6   ;;  %s892_s18 = sld [smem:[#allocation14_spill]] }
  0x6f   : > { %s893_s19 = sld [smem:[#allocation15_spill]]  ;;  %s896_s13 = smov %s585_s14 }
  0x70   : > { %s894_s25 = sld [smem:[#allocation16_spill]]  ;;  %s897_s14 = smov %s589_s15 }
  0x71   : > { %s895_s21 = sld [smem:[#allocation17_spill]]  ;;  %s898_s15 = smov %s750_s27 }
  0x72   : > { %s899_s16 = smov %s597_s17  ;;  %s900_s17 = smov %s601_s0 }
  0x73   : > { %s901_s0 = smov %s891_s20  ;;  %25 = sbr.rel (!%p23_p3) target bundleno = 15 (0xf), region = 69 }
  0x76   : > { %s902_s20 = smov %s894_s25 }
  0x78   :  { %254 = vsyncpa [#allocation5], 1 }
  0x79   :  { %256 = vsyncpa [#allocation5 + $0x1], 1 }
  0x7a   :  { %257 = vsyncpa [#allocation6], 1 }
  0x7b   :  { %259 = vsyncpa [#allocation6 + $0x1], 1 }

</bundles_post_ra>
